<compile_context>
chip_gen: v7x
topology: tpu7x:2x2x1
jax: 0.10.0
libtpu: 0.0.40
codegen_flags: <defaults>
</compile_context>

<pallas_src>
import functools
import math

import jax
import jax.numpy as jnp
from jax import lax
from jax.experimental import pallas as pl
from jax.experimental.pallas import tpu as pltpu


# ---------------------------------------------------------------------------
# Shape helpers (pad-to-multiple; tiles are always (8,128) aligned)
# ---------------------------------------------------------------------------

def _round_up(x, m):
    return ((x + m - 1) // m) * m


def _pick_tile(dim_rounded, desired, quantum):
    """Largest multiple of `quantum` that divides `dim_rounded` and <= desired."""
    best = quantum
    t = quantum
    limit = min(desired, dim_rounded)
    while t <= limit:
        if dim_rounded % t == 0:
            best = t
        t += quantum
    return best


def _pick_tk(K, max_tk):
    if K <= max_tk:
        return K
    return _pick_tile(K, max_tk, 128)


# ---------------------------------------------------------------------------
# Exact (erf-based) GELU == nn.GELU().  erf via Abramowitz & Stegun 7.1.26
# (max abs err 1.5e-7) so it lowers with only exp / mul / add / select.
# ---------------------------------------------------------------------------

_SQRT1_2 = 0.7071067811865476


def _erf_poly(x):
    a1, a2, a3, a4, a5 = (0.254829592, -0.284496736, 1.421413741,
                          -1.453152027, 1.061405429)
    p = 0.3275911
    ax = jnp.abs(x)
    t = 1.0 / (1.0 + p * ax)
    poly = ((((a5 * t + a4) * t + a3) * t + a2) * t + a1) * t
    y = 1.0 - poly * jnp.exp(-ax * ax)
    return jnp.where(x >= 0, y, -y)


def _gelu_exact(x):
    return 0.5 * x * (1.0 + _erf_poly(x * _SQRT1_2))


# ---------------------------------------------------------------------------
# Fused linear:  y = act(LN?(x) @ w + b) + residual?
#   x:(M,K) f32, w:(K,N) bf16 stored (in,out), b:(N,) f32
#   LN prologue (needs full K row), exact-GELU + residual epilogue.
# ---------------------------------------------------------------------------

def _fused_linear_kernel(*refs, nk, has_ln, has_resid, activation):
    it = iter(refs)
    x_ref, w_ref, b_ref = next(it), next(it), next(it)
    g_ref = next(it) if has_ln else None
    beta_ref = next(it) if has_ln else None
    r_ref = next(it) if has_resid else None
    o_ref = next(it)
    acc_ref = next(it) if nk > 1 else None

    # Prologue: (optional) LayerNorm in f32, then cast to bf16 for the MXU.
    x = x_ref[...].astype(jnp.float32)
    if has_ln:
        mu = jnp.mean(x, axis=-1, keepdims=True)
        xc = x - mu
        var = jnp.mean(xc * xc, axis=-1, keepdims=True)
        x = xc * lax.rsqrt(var + 1e-5) * g_ref[...] + beta_ref[...]
    part = jnp.dot(x.astype(jnp.bfloat16), w_ref[...].astype(jnp.bfloat16),
                   preferred_element_type=jnp.float32)

    def epilogue(acc):
        y = acc + b_ref[...]
        if activation == "gelu":
            y = _gelu_exact(y)
        if has_resid:
            y = y + r_ref[...].astype(jnp.float32)
        o_ref[...] = y.astype(o_ref.dtype)

    if nk == 1:
        epilogue(part)
    else:
        k = pl.program_id(2)

        @pl.when(k == 0)
        def _():
            acc_ref[...] = jnp.zeros_like(acc_ref)

        acc_ref[...] += part

        @pl.when(k == nk - 1)
        def _():
            epilogue(acc_ref[...])


def pallas_fused_linear(x, w, b, *, ln=None, activation=None, residual=None,
                        out_dtype=None, tm=256, tn=512, max_tk=512):
    M, K = x.shape
    K2, N = w.shape
    assert K == K2, "weight must be stored (in, out)"
    assert K % 128 == 0, "model dims keep K a multiple of 128 (hd % 128 == 0)"
    out_dtype = out_dtype or x.dtype
    has_ln = ln is not None
    has_resid = residual is not None

    M_pad = _round_up(M, 8)
    tm = _pick_tile(M_pad, tm, 8)
    N_pad = _round_up(N, 128)
    tn = _pick_tile(N_pad, tn, 128)
    tk = K if has_ln else _pick_tk(K, max_tk)   # LN prologue needs the full row
    nk = K // tk

    x_p = jnp.pad(x, ((0, M_pad - M), (0, 0))) if M_pad != M else x
    w_p = jnp.pad(w, ((0, 0), (0, N_pad - N))) if N_pad != N else w
    b_p = b.astype(jnp.float32).reshape(1, N)
    if N_pad != N:
        b_p = jnp.pad(b_p, ((0, 0), (0, N_pad - N)))

    inputs = [x_p, w_p, b_p]
    in_specs = [
        pl.BlockSpec((tm, tk), lambda i, j, k: (i, k)),
        pl.BlockSpec((tk, tn), lambda i, j, k: (k, j)),
        pl.BlockSpec((1, tn), lambda i, j, k: (0, j)),
    ]
    if has_ln:
        g, beta = ln
        inputs += [g.astype(jnp.float32).reshape(1, K),
                   beta.astype(jnp.float32).reshape(1, K)]
        in_specs += [pl.BlockSpec((1, K), lambda i, j, k: (0, 0)),
                     pl.BlockSpec((1, K), lambda i, j, k: (0, 0))]
    if has_resid:
        r_p = residual
        if M_pad != M or N_pad != N:
            r_p = jnp.pad(residual, ((0, M_pad - M), (0, N_pad - N)))
        inputs += [r_p]
        in_specs += [pl.BlockSpec((tm, tn), lambda i, j, k: (i, j))]

    kernel = functools.partial(_fused_linear_kernel, nk=nk, has_ln=has_ln,
                               has_resid=has_resid, activation=activation)
    out = pl.pallas_call(
        kernel,
        out_shape=jax.ShapeDtypeStruct((M_pad, N_pad), out_dtype),
        grid_spec=pltpu.PrefetchScalarGridSpec(
            num_scalar_prefetch=0,
            grid=(M_pad // tm, N_pad // tn, nk),
            in_specs=in_specs,
            out_specs=pl.BlockSpec((tm, tn), lambda i, j, k: (i, j)),
            scratch_shapes=([pltpu.VMEM((tm, tn), jnp.float32)]
                            if nk > 1 else []),
        ),
        compiler_params=pltpu.CompilerParams(
            dimension_semantics=("parallel", "parallel", "arbitrary")),
    )(*inputs)
    if M_pad != M or N_pad != N:
        out = out[:M, :N]
    return out


# ---------------------------------------------------------------------------
# Flash-style causal multi-head attention, fused head addressing
# ---------------------------------------------------------------------------

def _flash_attn_kernel(q_ref, k_ref, v_ref, o_ref, m_ref, l_ref, acc_ref,
                       *, sm_scale, tq, tk):
    qi = pl.program_id(1)
    ki = pl.program_id(2)
    # Last KV block containing any unmasked key for this query block; later
    # blocks lie entirely above the causal diagonal (compute skipped, and the
    # clamped index_map below means they are never DMA'd either).
    last_valid = ((qi + 1) * tq - 1) // tk
    # Block is entirely below the diagonal -> no masking needed.
    block_is_full = (ki + 1) * tk - 1 <= qi * tq

    @pl.when(ki == 0)
    def _():
        m_ref[...] = jnp.full_like(m_ref, -jnp.inf)
        l_ref[...] = jnp.zeros_like(l_ref)
        acc_ref[...] = jnp.zeros_like(acc_ref)

    def update(apply_mask):
        # sm_scale folded into the (tq,hd) q tile, not the (tq,tk) score tile.
        q = (q_ref[0] * sm_scale).astype(jnp.bfloat16)   # (tq, hd)
        k = k_ref[0].astype(jnp.bfloat16)                # (tk, hd)
        v = v_ref[0].astype(jnp.bfloat16)                # (tk, hd)
        s = lax.dot_general(q, k, (((1,), (1,)), ((), ())),
                            preferred_element_type=jnp.float32)
        if apply_mask:
            row = qi * tq + lax.broadcasted_iota(jnp.int32, s.shape, 0)
            col = ki * tk + lax.broadcasted_iota(jnp.int32, s.shape, 1)
            s = jnp.where(col <= row, s, -jnp.inf)
        m_prev = m_ref[...]
        m_new = jnp.maximum(m_prev, jnp.max(s, axis=-1, keepdims=True))
        alpha = jnp.exp(m_prev - m_new)
        p = jnp.exp(s - m_new)
        l_ref[...] = alpha * l_ref[...] + jnp.sum(p, axis=-1, keepdims=True)
        acc_ref[...] = alpha * acc_ref[...] + jnp.dot(
            p.astype(jnp.bfloat16), v, preferred_element_type=jnp.float32)
        m_ref[...] = m_new

    @pl.when(jnp.logical_and(ki <= last_valid, block_is_full))
    def _():
        update(apply_mask=False)

    @pl.when(jnp.logical_and(ki <= last_valid,
                             jnp.logical_not(block_is_full)))
    def _():
        update(apply_mask=True)

    @pl.when(ki == last_valid)
    def _():
        inv_l = pl.reciprocal(l_ref[...], approx=True)   # EUP slot, ~free
        o_ref[0] = (acc_ref[...] * inv_l).astype(o_ref.dtype)


def pallas_causal_attention(qkv, n_head, *, block_t=256):
    """qkv:(B,T,3C) fused c_attn output -> (B,T,C) attention output.

    Heads are addressed purely through BlockSpec index_maps (q at column
    block h, k at n_head+h, v at 2*n_head+h), so the q/k/v split and head
    merge never materialize in HBM.  Leading grid axis is B*n_head so both
    v7x TensorCores get work even at B=1.
    """
    B, T, threeC = qkv.shape
    C = threeC // 3
    hd = C // n_head
    assert hd % 128 == 0, "head_dim must be lane-aligned (multiple of 128)"

    T_r = _round_up(T, 8)
    bt = _pick_tile(T_r, max(8, block_t), 8)
    T_pad = T_r
    if T_pad != T:
        qkv = jnp.pad(qkv, ((0, 0), (0, T_pad - T), (0, 0)))
    sm_scale = 1.0 / math.sqrt(hd)
    grid = (B * n_head, T_pad // bt, T_pad // bt)

    def q_map(bh, qi, ki):
        return (bh // n_head, qi, bh % n_head)

    def k_map(bh, qi, ki):
        kv = jnp.minimum(ki, ((qi + 1) * bt - 1) // bt)   # clamp: no DMA of
        return (bh // n_head, kv, n_head + bh % n_head)   # above-diag blocks

    def v_map(bh, qi, ki):
        kv = jnp.minimum(ki, ((qi + 1) * bt - 1) // bt)
        return (bh // n_head, kv, 2 * n_head + bh % n_head)

    kernel = functools.partial(_flash_attn_kernel,
                               sm_scale=sm_scale, tq=bt, tk=bt)
    out = pl.pallas_call(
        kernel,
        out_shape=jax.ShapeDtypeStruct((B, T_pad, C), qkv.dtype),
        grid_spec=pltpu.PrefetchScalarGridSpec(
            num_scalar_prefetch=0,
            grid=grid,
            in_specs=[
                pl.BlockSpec((1, bt, hd), q_map),
                pl.BlockSpec((1, bt, hd), k_map),
                pl.BlockSpec((1, bt, hd), v_map),
            ],
            out_specs=pl.BlockSpec((1, bt, hd), q_map),
            scratch_shapes=[
                pltpu.VMEM((bt, 1), jnp.float32),    # running max
                pltpu.VMEM((bt, 1), jnp.float32),    # running denom
                pltpu.VMEM((bt, hd), jnp.float32),   # output accumulator
            ],
        ),
        compiler_params=pltpu.CompilerParams(
            dimension_semantics=("parallel", "parallel", "arbitrary")),
    )(qkv, qkv, qkv)
    return out[:, :T, :] if T_pad != T else out


# ---------------------------------------------------------------------------
# Model forward: every LN / GELU / residual is fused into a matmul kernel.
# ---------------------------------------------------------------------------

def transformer_forward(idx, params, config):
    B, T = idx.shape
    C = config["n_embd"]
    n_head = config["n_head"]
    bt = config.get("attn_block_t", 256)

    tok = jnp.take(params["wte"], idx, axis=0)          # (B, T, C)
    pos = params["wpe"][:T][None, :, :]                 # (1, T, C)
    x = (tok + pos).reshape(B * T, C)                   # embd dropout = id

    for lp in params["blocks"]:
        # LN1 fused into the qkv projection prologue.
        qkv = pallas_fused_linear(x, lp["w_attn"], lp["b_attn"],
                                  ln=(lp["ln1_g"], lp["ln1_b"]))
        y = pallas_causal_attention(qkv.reshape(B, T, 3 * C), n_head,
                                    block_t=bt).reshape(B * T, C)
        # Residual add fused into the attention output projection epilogue.
        x = pallas_fused_linear(y, lp["w_proj"], lp["b_proj"], residual=x)
        # LN2 + exact GELU fused into the c_fc kernel.
        h = pallas_fused_linear(x, lp["w_fc"], lp["b_fc"],
                                ln=(lp["ln2_g"], lp["ln2_b"]),
                                activation="gelu")
        # Residual add fused into the MLP output projection epilogue.
        x = pallas_fused_linear(h, lp["w_cproj"], lp["b_cproj"], residual=x)

    # Inference path (targets=None): logits only for the last position, with
    # the final LayerNorm fused into the lm_head prologue (row-wise LN makes
    # this identical to LN-then-slice).
    x_last = x.reshape(B, T, C)[:, -1, :]               # (B, C)
    logits = pallas_fused_linear(x_last, params["w_lm"], params["b_lm"],
                                 ln=(params["lnf_g"], params["lnf_b"]))
    return logits.reshape(B, 1, -1)


# ---------------------------------------------------------------------------
# Pure-JAX reference (correctness oracle; uses the same bf16-rounded weights)
# ---------------------------------------------------------------------------

def reference_forward(idx, params, config):
    B, T = idx.shape
    C = config["n_embd"]
    n_head = config["n_head"]
    hd = C // n_head
    f32 = lambda a: a.astype(jnp.float32)

    def layernorm(v, g, b):
        mu = jnp.mean(v, axis=-1, keepdims=True)
        var = jnp.mean((v - mu) ** 2, axis=-1, keepdims=True)
        return (v - mu) / jnp.sqrt(var + 1e-5) * g + b

    x = jnp.take(params["wte"], idx, axis=0) + params["wpe"][:T][None]
    for lp in params["blocks"]:
        h = layernorm(x, lp["ln1_g"], lp["ln1_b"])
        qkv = h @ f32(lp["w_attn"]) + lp["b_attn"]
        q, k, v = jnp.split(qkv, 3, axis=-1)
        heads = lambda a: a.reshape(B, T, n_head, hd).transpose(0, 2, 1, 3)
        q, k, v = heads(q), heads(k), heads(v)
        s = jnp.einsum("bhqd,bhkd->bhqk", q, k) / math.sqrt(hd)
        mask = jnp.tril(jnp.ones((T, T), dtype=bool))
        s = jnp.where(mask[None, None], s, -jnp.inf)
        p = jax.nn.softmax(s, axis=-1)
        y = jnp.einsum("bhqk,bhkd->bhqd", p, v)
        y = y.transpose(0, 2, 1, 3).reshape(B, T, C)
        x = x + (y @ f32(lp["w_proj"]) + lp["b_proj"])
        h = layernorm(x, lp["ln2_g"], lp["ln2_b"])
        m = jax.nn.gelu(h @ f32(lp["w_fc"]) + lp["b_fc"], approximate=False)
        x = x + (m @ f32(lp["w_cproj"]) + lp["b_cproj"])
    x = layernorm(x, params["lnf_g"], params["lnf_b"])
    return x[:, -1:, :] @ f32(params["w_lm"]) + params["b_lm"]


# ---------------------------------------------------------------------------
# Parameters: linear weights stored (in,out) AND cast to bf16 ONCE here (the
# MXU runs bf16; biases / LN params / embeddings stay f32).
# ---------------------------------------------------------------------------

def init_params(key, config):
    V = config["vocab_size"]
    C = config["n_embd"]
    L = config["n_layer"]
    P = config["max_position_embeddings"]
    std = 0.02
    proj_std = 0.02 / math.sqrt(2 * L)
    bf16 = jnp.bfloat16

    keys = jax.random.split(key, 2 + L)
    wte = std * jax.random.normal(keys[0], (V, C), jnp.float32)
    wpe = std * jax.random.normal(keys[1], (P, C), jnp.float32)

    blocks = []
    for l in range(L):
        k0, k1, k2, k3 = jax.random.split(keys[2 + l], 4)
        blocks.append(dict(
            ln1_g=jnp.ones((C,), jnp.float32),
            ln1_b=jnp.zeros((C,), jnp.float32),
            w_attn=(std * jax.random.normal(k0, (C, 3 * C), jnp.float32)).astype(bf16),
            b_attn=jnp.zeros((3 * C,), jnp.float32),
            w_proj=(proj_std * jax.random.normal(k1, (C, C), jnp.float32)).astype(bf16),
            b_proj=jnp.zeros((C,), jnp.float32),
            ln2_g=jnp.ones((C,), jnp.float32),
            ln2_b=jnp.zeros((C,), jnp.float32),
            w_fc=(std * jax.random.normal(k2, (C, 4 * C), jnp.float32)).astype(bf16),
            b_fc=jnp.zeros((4 * C,), jnp.float32),
            w_cproj=(proj_std * jax.random.normal(k3, (4 * C, C), jnp.float32)).astype(bf16),
            b_cproj=jnp.zeros((C,), jnp.float32),
        ))

    return dict(
        wte=wte, wpe=wpe, blocks=blocks,
        lnf_g=jnp.ones((C,), jnp.float32),
        lnf_b=jnp.zeros((C,), jnp.float32),
        w_lm=wte.T.astype(bf16),     # weight tying, transposed + cast once
        b_lm=jnp.zeros((V,), jnp.float32),   # lm_head has no bias (kept zero)
    )


# ---------------------------------------------------------------------------
# Main
# ---------------------------------------------------------------------------

if __name__ == "__main__":
    # Small config: head_dim = 256/2 = 128 (lane-aligned), 2 layers.  Tiny
    # attention tiles + T not divisible by the tile exercise the causal skip,
    # the masked/unmasked split and the pad-to-multiple paths.
    config = dict(
        vocab_size=128,
        n_embd=256,
        n_head=2,
        n_layer=2,
        max_position_embeddings=32,
        attn_block_t=8,       # production default would be 256 (v6e/v7x MXU)
    )
    B, T = 2, 14              # T deliberately NOT a multiple of the attn tile

    key = jax.random.PRNGKey(0)
    kp, ki = jax.random.split(key)
    params = init_params(kp, config)
    idx = jax.random.randint(ki, (B, T), 0, config["vocab_size"], jnp.int32)

    logits = transformer_forward(idx, params, config)
    logits = jax.block_until_ready(logits)

    ref = reference_forward(idx, params, config)
    assert logits.shape == (B, 1, config["vocab_size"])
    # Tolerance accounts for bf16 MXU inputs + the approx (EUP) reciprocal in
    # the attention epilogue; both paths use the same bf16-rounded weights.
    max_err = float(jnp.max(jnp.abs(logits - ref)))
    assert jnp.allclose(logits, ref, atol=2e-2, rtol=2e-2), (
        "mismatch vs reference: max abs err %e" % max_err)

    print("KERNEL_OK")
</pallas_src>

<mosaic_0001>
module attributes {stable_mosaic.version = 11 : i64} {
  func.func @_fused_linear_kernel(%arg0: i32, %arg1: i32, %arg2: i32, %arg3: memref<32x256xf32, #tpu.memory_space<vmem>>, %arg4: memref<256x384xbf16, #tpu.memory_space<vmem>>, %arg5: memref<1x384xf32, #tpu.memory_space<vmem>>, %arg6: memref<1x256xf32, #tpu.memory_space<vmem>>, %arg7: memref<1x256xf32, #tpu.memory_space<vmem>>, %arg8: memref<32x384xf32, #tpu.memory_space<vmem>>) attributes {dimension_semantics = [#tpu.dimension_semantics<parallel>, #tpu.dimension_semantics<parallel>, #tpu.dimension_semantics<arbitrary>], iteration_bounds = array<i64: 1, 2, 1>, scalar_prefetch = 0 : i64, scratch_operands = 0 : i64, tpu.core_type = #tpu.core_type<tc>, window_params = [{transform_indices = @transform_0, window_bounds = array<i64: 32, 256>}, {transform_indices = @transform_1, window_bounds = array<i64: 256, 384>}, {transform_indices = @transform_2, window_bounds = array<i64: 1, 384>}, {pipeline_mode = #tpu.pipeline_mode<synchronous>, transform_indices = @transform_3, window_bounds = array<i64: 1, 256>}, {pipeline_mode = #tpu.pipeline_mode<synchronous>, transform_indices = @transform_4, window_bounds = array<i64: 1, 256>}, {transform_indices = @transform_5, window_bounds = array<i64: 32, 384>}]} {
    %c0 = arith.constant 0 : index
    %c0_0 = arith.constant 0 : index
    %0 = vector.load %arg3[%c0, %c0_0] : memref<32x256xf32, #tpu.memory_space<vmem>>, vector<32x256xf32>
    %cst = arith.constant dense<0.000000e+00> : vector<32xf32>
    %1 = vector.multi_reduction <add>, %0, %cst [1] : vector<32x256xf32> to vector<32xf32>
    %2 = vector.shape_cast %1 : vector<32xf32> to vector<32x1xf32>
    %cst_1 = arith.constant 2.560000e+02 : f32
    %3 = vector.broadcast %cst_1 : f32 to vector<32x1xf32>
    %4 = arith.divf %2, %3 : vector<32x1xf32>
    %5 = vector.broadcast %4 : vector<32x1xf32> to vector<32x256xf32>
    %6 = arith.subf %0, %5 : vector<32x256xf32>
    %7 = arith.mulf %6, %6 : vector<32x256xf32>
    %cst_2 = arith.constant dense<0.000000e+00> : vector<32xf32>
    %8 = vector.multi_reduction <add>, %7, %cst_2 [1] : vector<32x256xf32> to vector<32xf32>
    %9 = vector.shape_cast %8 : vector<32xf32> to vector<32x1xf32>
    %cst_3 = arith.constant 2.560000e+02 : f32
    %10 = vector.broadcast %cst_3 : f32 to vector<32x1xf32>
    %11 = arith.divf %9, %10 : vector<32x1xf32>
    %cst_4 = arith.constant 9.99999974E-6 : f32
    %12 = vector.broadcast %cst_4 : f32 to vector<32x1xf32>
    %13 = arith.addf %11, %12 : vector<32x1xf32>
    %14 = math.rsqrt %13 : vector<32x1xf32>
    %15 = vector.broadcast %14 : vector<32x1xf32> to vector<32x256xf32>
    %16 = arith.mulf %6, %15 : vector<32x256xf32>
    %c0_5 = arith.constant 0 : index
    %c0_6 = arith.constant 0 : index
    %17 = vector.load %arg6[%c0_5, %c0_6] : memref<1x256xf32, #tpu.memory_space<vmem>>, vector<1x256xf32>
    %18 = vector.broadcast %17 : vector<1x256xf32> to vector<32x256xf32>
    %19 = arith.mulf %16, %18 : vector<32x256xf32>
    %c0_7 = arith.constant 0 : index
    %c0_8 = arith.constant 0 : index
    %20 = vector.load %arg7[%c0_7, %c0_8] : memref<1x256xf32, #tpu.memory_space<vmem>>, vector<1x256xf32>
    %21 = vector.broadcast %20 : vector<1x256xf32> to vector<32x256xf32>
    %22 = arith.addf %19, %21 : vector<32x256xf32>
    %23 = arith.truncf %22 : vector<32x256xf32> to vector<32x256xbf16>
    %c0_9 = arith.constant 0 : index
    %c0_10 = arith.constant 0 : index
    %24 = vector.load %arg4[%c0_9, %c0_10] : memref<256x384xbf16, #tpu.memory_space<vmem>>, vector<256x384xbf16>
    %cst_11 = arith.constant dense<0.000000e+00> : vector<32x384xf32>
    %25 = tpu.matmul %23, %24, %cst_11 {dimension_numbers = #tpu.dot_dimension_numbers<[1], [0], [0], [1], [0, 0, 1, 1], [], []>} : vector<32x256xbf16>, vector<256x384xbf16>, vector<32x384xf32> -> vector<32x384xf32>
    %c0_12 = arith.constant 0 : index
    %c0_13 = arith.constant 0 : index
    %26 = vector.load %arg5[%c0_12, %c0_13] : memref<1x384xf32, #tpu.memory_space<vmem>>, vector<1x384xf32>
    %27 = vector.broadcast %26 : vector<1x384xf32> to vector<32x384xf32>
    %28 = arith.addf %25, %27 : vector<32x384xf32>
    %c0_14 = arith.constant 0 : index
    %c0_15 = arith.constant 0 : index
    %29 = vector.load %arg8[%c0_14, %c0_15] : memref<32x384xf32, #tpu.memory_space<vmem>>, vector<32x384xf32>
    tpu.vector_store %arg8[%c0_14, %c0_15], %28 {strides = array<i32>} : memref<32x384xf32, #tpu.memory_space<vmem>>, vector<32x384xf32>,
    return
  }
  func.func @transform_0(%arg0: i32, %arg1: i32, %arg2: i32) -> (i32, i32) {
    %c0_i32 = arith.constant 0 : i32
    return %arg0, %arg2 : i32, i32
  }
  func.func @transform_1(%arg0: i32, %arg1: i32, %arg2: i32) -> (i32, i32) {
    %c0_i32 = arith.constant 0 : i32
    return %arg2, %arg1 : i32, i32
  }
  func.func @transform_2(%arg0: i32, %arg1: i32, %arg2: i32) -> (i32, i32) {
    %c0_i32 = arith.constant 0 : i32
    %c0_i32_0 = arith.constant 0 : i32
    return %c0_i32, %arg1 : i32, i32
  }
  func.func @transform_3(%arg0: i32, %arg1: i32, %arg2: i32) -> (i32, i32) {
    %c0_i32 = arith.constant 0 : i32
    %c0_i32_0 = arith.constant 0 : i32
    %c0_i32_1 = arith.constant 0 : i32
    return %c0_i32, %c0_i32_0 : i32, i32
  }
  func.func @transform_4(%arg0: i32, %arg1: i32, %arg2: i32) -> (i32, i32) {
    %c0_i32 = arith.constant 0 : i32
    %c0_i32_0 = arith.constant 0 : i32
    %c0_i32_1 = arith.constant 0 : i32
    return %c0_i32, %c0_i32_0 : i32, i32
  }
  func.func @transform_5(%arg0: i32, %arg1: i32, %arg2: i32) -> (i32, i32) {
    %c0_i32 = arith.constant 0 : i32
    return %arg0, %arg1 : i32, i32
  }
}

</mosaic_0001>

<bundles_post_ra>
// kernel: tpu_custom_call.1
= control target key start
LH: loop header
LB: loop body
LE: loop exit
PB: predicated region body
PF: predicated region fallthrough
CT: control target
= control target key end

     0   :  { %10 = vsyncpa [#allocation3], 0  ;;  %s1821_s0 = inlined_call_operand.hbm [shape: f32[32,256], index: 0, kind: input, shape index: {}]   ;;  %s1822_s1 = inlined_call_operand.hbm [shape: bf16[256,768], index: 1, kind: input, shape index: {}]   ;;  %s1823_s2 = inlined_call_operand.vmem [shape: f32[1,768], index: 2, kind: input, shape index: {}]   ;;  %s1824_s3 = inlined_call_operand.vmem [shape: f32[1,256], index: 3, kind: input, shape index: {}]   ;;  %s1825_s4 = inlined_call_operand.vmem [shape: f32[1,256], index: 4, kind: input, shape index: {}]   ;;  %s1826_s5 = inlined_call_operand.hbm [shape: f32[32,768], index: 5, kind: output, shape index: {}]  }
   0x1   :  { %11 = vsyncpa [#allocation6], 0 }
   0x2   :  { %13 = vsyncpa [#allocation6 + $0x1], 0 }
   0x3   :  { %14 = vsyncpa [#allocation4], 0 }
   0x4   :  { %16 = vsyncpa [#allocation4 + $0x1], 0  ;;  %s1456_s18 = smov 0   ;;  %s1458_s19 = smov 0  }
   0x5   :  { %s1460_s20 = smov 0   ;;  %s1462_s21 = smov 0  }
   0x6   :  { %s1464_s22 = smov 0   ;;  %s1466_s23 = smov 0  }
   0x7 LB: > { %1836 = sst [smem:[#allocation11_spill]] %s1413_s23  ;;  %s1024_s24 = sadd.s32 4294967295, %s1413_s23   ;;  %s1413_s23 = sphi %s1466_s23, %s22_s23   ;;  %s1409_s22 = sphi %s1464_s22, %s1862_s22   ;;  %s1405_s21 = sphi %s1462_s21, %s1861_s21   ;;  %s1401_s20 = sphi %s1460_s20, %s1860_s20   ;;  %s1397_s19 = sphi %s1458_s19, %s1859_s19   ;;  %s1393_s18 = sphi %s1456_s18, %s1858_s18  }
   0x8   : > { %s1025_s25 = sadd.s32 4294967294, %s1413_s23   ;;  %p85_p0 = scmp.ne.s32.totalorder %s1401_s20, %s1397_s19 }
   0x9   : > { %p86_p1 = scmp.eq.s32.totalorder %s1413_s23, 0  ;;  %p91_p2 = scmp.ne.s32.totalorder %s1397_s19, %s1393_s18 }
   0xa   : > { %p1494_p3 = scmp.eq.s32.totalorder %s1024_s24, 0  ;;  %p185_p4 = scmp.eq.s32.totalorder %s1024_s24, 1 }
   0xb   : > { %p1498_p5 = por %p86_p1, %p85_p0  ;;  %p191_p6 = scmp.eq.s32.totalorder %s1025_s25, 1 }
   0xc   : > { %s1837_s27 = scalar_select %p1494_p3, 1, 0 }
   0xd   : > { %p1504_p7 = por %p1494_p3, %p91_p2  ;;  %p1508_p8 = por %p185_p4, %p85_p0 }
   0xe   : > { %p1512_p9 = por %p191_p6, %p91_p2  ;;  %p1026_p10 = scmp.ge.s32.totalorder %s1413_s23, 1 }
   0xf   : > { %s1839_s29 = scalar_select %p1504_p7, 1, 0 }
  0x10   : > { %s1840_s30 = scalar_select %p1508_p8, 1, 0 }
  0x11   : > { %s1841_s6 = scalar_select %p1512_p9, 1, 0 }
  0x12   : > { %p198_p11 = scmp.lt.s32.totalorder %s1413_s23, 3  ;;  %s1415_s8 = smov [#allocation2]  }
  0x13   : > { %1842 = sst [smem:[#allocation12_spill]] %s1841_s6  ;;  %s216_s9 = sshll.u32 %s1415_s8, 4  ;;  %s1522_s9 = int_to_ptr.vmem [resolvable:$true] %s216_s9 }
  0x14   : > { %p1518_p12 = pnand %p1026_p10, %p198_p11  ;;  %p1137_p1 = scmp.lt.s32.totalorder %s1413_s23, 2 }
  0x15   : > { %s37_s12 = sadd.s32 1, %s1409_s22  ;;  %s1269_s16 = scalar_lea.hbm %s1821_s0, 1024 }
  0x16   : > { %s1843_s7 = scalar_select %p1518_p12, 1, 0 }
  0x17   : > { %p1124_p13 = pneg %p1518_p12  ;;  %p1536_p4 = pnand %p1137_p1, %p1498_p5 }
  0x18   : > { %p1541_p6 = scmp.ge.s32.totalorder %s37_s12, 2  ;;  %p1270_p10 = scmp.ne.s32.totalorder %s1821_s0, %s1269_s16 }
  0x19   : > { %p1530_p2 = pnand %p1124_p13, %p1494_p3  ;;  %p1276_p1 = scmp.lt.u32.totalorder %s1269_s16, %s1821_s0 }
  0x1a   : > { %s1845_s11 = scalar_select %p1536_p4, 1, 0 }
  0x1b   : > { %s1846_s13 = scalar_select %p1541_p6, 1, 0 }
  0x1c   : > { %p1271_p11 = pneg %p1530_p2 }
  0x1e   : > { %p1272_p13 = pnand %p1271_p11, %p1270_p10 }
  0x20   : > { %p1273_p5 = pneg %p1272_p13 }
  0x22   : > { %p1278_p0 = pnand %p1276_p1, %p1273_p5 }
  0x24   : > { %1281 = shalt.err (!%p1278_p0)
}
  0x25   : > { %s1282_s8 = scalar_lea.vmem %s1522_s9, 1024  ;;  %p1290_p3 = scmp.lt.s32.totalorder %s1522_s9, %s1522_s9 }
  0x26   : > { %p1283_p9 = scmp.ne.s32.totalorder %s1522_s9, %s1282_s8  ;;  %p1291_p12 = scmp.lt.s32.totalorder %s1282_s8, %s1282_s8 }
  0x28   : > { %p1285_p8 = pnand %p1283_p9, %p1271_p11  ;;  %p1292_p4 = por %p1291_p12, %p1290_p3 }
  0x2a   : > { %p1286_p7 = pneg %p1285_p8 }
  0x2c   : > { %p1293_p6 = pnand %p1292_p4, %p1286_p7 }
  0x2e   : > { %1296 = shalt.err (!%p1293_p6)
}
  0x2f   : > { %s1416_s14 = smov 256   ;;  %s1417_s15 = smov 16  }
  0x30   : > { %1127 = dma.hbm_to_vmem [thread:$0]  (!%p1530_p2), %s1821_s0, 1024, %s1522_s9, [#allocation3], %s1416_s14, %s1416_s14, %s1417_s15  }
  0x31   : > { %s236_s24 = sand.u32 1, %s1401_s20   ;;  %p1847_p3 = scmp.ne.s32.totalorder %s1846_s13, 0 }
  0x32   : > { %s1113_s25 = smul.u32 384, %s236_s24  ;;  %s1848_s14 = sadd.s32 1, %s1401_s20 }
  0x33   : > { %s1864_s12 = smov (%p1847_p3, %s37_s12), 0  ;;  %s1083_s8 = smul.u32 192, %s1409_s22 }
  0x34   : > { %s74_s28 = ssub.s32 %s1409_s22, %s1864_s12  ;;  %s240_s9 = scalar_lea.vmem [#allocation5], %s1113_s25 }
  0x35   : > { %p76_p7 = scmp.eq.s32.totalorder %s74_s28, 0  ;;  %s1577_s6 = scalar_lea.hbm %s1822_s1, %s1083_s8 }
  0x36   : > { %s250_s10 = sshll.u32 %s240_s9, 4  ;;  %s1586_s15 = scalar_lea.sflag [#allocation6], %s236_s24  ;;  %s1584_s10 = int_to_ptr.vmem [resolvable:$true] %s250_s10 }
  0x37   : > { %s1582_s13 = scalar_select %p76_p7, %s1401_s20, %s1848_s14  }
  0x38   : > { %s1297_s16 = scalar_lea.hbm %s1577_s6, 6144  ;;  %p1849_p9 = scmp.ne.s32.totalorder %s1845_s11, 0 }
  0x39   : > { %p1298_p8 = scmp.ne.s32.totalorder %s1577_s6, %s1297_s16  ;;  %s1302_s17 = scalar_lea.hbm %s1822_s1, 12288 }
  0x3a   : > { %p1299_p12 = pneg %p1849_p9  ;;  %p1303_p4 = scmp.lt.u32.totalorder %s1577_s6, %s1822_s1 }
  0x3b   : > { %p1304_p6 = scmp.lt.u32.totalorder %s1302_s17, %s1297_s16  ;;  %p1306_p11 = scmp.lt.u32.totalorder %s1297_s16, %s1577_s6 }
  0x3c   : > { %p1300_p0 = pnand %p1299_p12, %p1298_p8 }
  0x3d   : > { %p1305_p10 = por %p1304_p6, %p1303_p4 }
  0x3e   : > { %p1301_p2 = pneg %p1300_p0 }
  0x3f   : > { %p1307_p13 = por %p1306_p11, %p1305_p10 }
  0x41   : > { %p1308_p5 = pnand %p1307_p13, %p1301_p2 }
  0x43   : > { %1311 = shalt.err (!%p1308_p5)
}
  0x44   : > { %s1312_s24 = scalar_lea.vmem %s1584_s10, 6144  ;;  %s1418_s8 = smov [#allocation5]  }
  0x45   : > { %p1313_p1 = scmp.ne.s32.totalorder %s1584_s10, %s1312_s24  ;;  %s1317_s9 = sshll.u32 %s1418_s8, 4  ;;  %s1318_s9 = int_to_ptr.vmem [resolvable:$false] %s1317_s9 }
  0x46   : > { %s1319_s14 = scalar_lea.vmem %s1318_s9, 12288  ;;  %p1320_p8 = scmp.lt.s32.totalorder %s1584_s10, %s1318_s9 }
  0x47   : > { %p1315_p3 = pnand %p1313_p1, %p1299_p12  ;;  %p1321_p0 = scmp.lt.s32.totalorder %s1319_s14, %s1312_s24 }
  0x49   : > { %p1316_p7 = pneg %p1315_p3  ;;  %p1322_p4 = por %p1321_p0, %p1320_p8 }
  0x4b   : > { %p1323_p6 = pnand %p1322_p4, %p1316_p7 }
  0x4d   : > { %1326 = shalt.err (!%p1323_p6)
}
  0x4e   : > { %s1419_s16 = smov 384   ;;  %s1420_s23 = smov 192  }
  0x4f   : > { %s1421_s26 = smov 12   ;;  %p1850_p12 = scmp.ne.s32.totalorder %s1843_s7, 0 }
  0x50   : > { %1131 = dma.hbm_to_vmem [thread:$0]  (!%p1849_p9), %s1577_s6, 6144, %s1584_s10, %s1586_s15, %s1419_s16, %s1420_s23, %s1421_s26  }
  0x51   : > { %270 = sbr.rel (%p1850_p12) target bundleno = 660 (0x294), region = 40  ;;  %p1851_p2 = scmp.ne.s32.totalorder (!%p1850_p12), %s1837_s27, 0 }
  0x58   : > { %1380 = dma.done.wait (%p1851_p2), [#allocation3], 1024  }
  0x59   : > { %1382 = vsyncadd (%p1851_p2), [#allocation3], 4294966272  ;;  %s1621_s17 = sand.u32 1, %s1397_s19   ;;  %p1852_p9 = scmp.ne.s32.totalorder %s1839_s29, 0 }
  0x5a   : > { %s1114_s25 = smul.u32 384, %s1621_s17  ;;  %s277_s28 = scalar_lea.sflag [#allocation6], %s1621_s17 }
  0x5c   : > { %s1625_s24 = scalar_lea.vmem [#allocation5], %s1114_s25 }
  0x5d   : > { %1384 = dma.done.wait (%p1852_p9), %s277_s28, 6144  }
  0x5e   : > { %1386 = vsyncadd (%p1852_p9), %s277_s28, 4294961152  ;;  %v323_v0 = vld [vmem:[#allocation2] sm:$0xff]  ;;  %v324_v1 = vld [vmem:[#allocation2 + $0x8] sm:$0xff]  ;;  %s315_s11 = smul.u32 3, %s1405_s21  ;;  %s892_s28 = scalar_lea.sflag [#allocation4], %s1621_s17 }
  0x5f   : > { %v327_v2 = vld [vmem:[#allocation2 + $0x20] sm:$0xff]  ;;  %v331_v3 = vadd.f32 %v324_v1, %v323_v0  ;;  %v328_v4 = vld [vmem:[#allocation2 + $0x28] sm:$0xff]  ;;  %v1631_v5 = vld [vmem:[#allocation2 + $0x10] sm:$0xff]  ;;  %s1115_s9 = smul.u32 96, %s1621_s17  ;;  %p1853_p13 = scmp.ne.s32.totalorder %s1840_s30, 0 }
  0x60   : > { %v1633_v6 = vld [vmem:[#allocation2 + $0x18] sm:$0xff]  ;;  %v337_v7 = vadd.f32 %v328_v4, %v327_v2  ;;  %v1635_v8 = vld [vmem:[#allocation2 + $0x30] sm:$0xff]  ;;  %v1199_v13 = vld [vmem:[%s1625_s24] ss:$12 sps:$4 sm:$0xff]   ;;  %p316_p10 = scmp.lt.s32.totalorder %s315_s11, 5  ;;  %s1084_s23 = smul.u32 384, %s1405_s21 }
  0x61   : > { %v1637_v9 = vld [vmem:[#allocation2 + $0x38] sm:$0xff]  ;;  %332 = vadd.xlane.f32.xlu0 %v331_v3  ;;  %v334_v10 = vadd.f32 %v1633_v6, %v1631_v5  ;;  %v1197_v12 = vld [vmem:[%s1625_s24 + $0x4] ss:$12 sps:$4 sm:$0xff]   ;;  %v1203_v16 = vld [vmem:[%s1625_s24 + $0x34] ss:$12 sps:$4 sm:$0xff]   ;;  %s1751_s14 = scalar_lea.vmem [#allocation7], %s1115_s9 }
  0x62   : > { %338 = vadd.xlane.f32.xlu1 %v337_v7  ;;  %v340_v11 = vadd.f32 %v1637_v9, %v1635_v8  ;;  %v1200_v14 = vld [vmem:[%s1625_s24 + $0x1c] ss:$12 sps:$4 sm:$0xff]   ;;  %777 = vmatprep.subr.bf16.mxu0 %v1197_v12  ;;  %v1202_v15 = vld [vmem:[%s1625_s24 + $0x18] ss:$12 sps:$4 sm:$0xff]   ;;  %v1211_v23 = vld [vmem:[%s1625_s24 + $0x60] ss:$12 sps:$4 sm:$0xff]   ;;  %s1769_s25 = scalar_lea.hbm %s1826_s5, %s1084_s23 }
  0x63   : > { %778 = vmatpush1.bf16.msra.mxu0 %v1199_v13  ;;  %v1223_v17 = vld [vmem:[%s1625_s24 + $0xc8] ss:$12 sps:$4 sm:$0xff]   ;;  %v1205_v19 = vld [vmem:[%s1625_s24 + $0x30] ss:$12 sps:$4 sm:$0xff]   ;;  %v1206_v20 = vld [vmem:[%s1625_s24 + $0x4c] ss:$12 sps:$4 sm:$0xff]  }
  0x64   : > { %779 = vmatprep.subr.bf16.mxu0 %v1200_v14  ;;  %v1225_v18 = vld [vmem:[%s1625_s24 + $0x8] ss:$12 sps:$4 sm:$0xff]   ;;  %1085 = vmatprep.subr.bf16.mxu1 %v1223_v17  ;;  %v1209_v22 = vld [vmem:[%s1625_s24 + $0x64] ss:$12 sps:$4 sm:$0xff]   ;;  %v1218_v28 = vld [vmem:[%s1625_s24 + $0xac] ss:$12 sps:$4 sm:$0xff]  }
  0x65   : > { %335 = vadd.xlane.f32.xlu0 %v334_v10  ;;  %1086 = vmatpush3.bf16.msra.mxu1 %v1225_v18  ;;  %v1208_v21 = vld [vmem:[%s1625_s24 + $0x48] ss:$12 sps:$4 sm:$0xff]   ;;  %v1214_v25 = vld [vmem:[%s1625_s24 + $0x78] ss:$12 sps:$4 sm:$0xff]   ;;  %v1217_v27 = vld [vmem:[%s1625_s24 + $0x90] ss:$12 sps:$4 sm:$0xff]  }
  0x66   : > { %341 = vadd.xlane.f32.xlu1 %v340_v11  ;;  %v1212_v24 = vld [vmem:[%s1625_s24 + $0x7c] ss:$12 sps:$4 sm:$0xff]   ;;  %v1215_v26 = vld [vmem:[%s1625_s24 + $0x94] ss:$12 sps:$4 sm:$0xff]   ;;  %v1221_v30 = vld [vmem:[%s1625_s24 + $0xc4] ss:$12 sps:$4 sm:$0xff]  }
  0x67   : > { %780 = vmatpush1.bf16.msra.mxu0 %v1202_v15  ;;  %v1220_v29 = vld [vmem:[%s1625_s24 + $0xa8] ss:$12 sps:$4 sm:$0xff]   ;;  %v1224_v31 = vld [vmem:[%s1625_s24 + $0xc0] ss:$12 sps:$4 sm:$0xff]   ;;  %v1229_v62 = vld [vmem:[%s1625_s24 + $0xd8] ss:$12 sps:$4 sm:$0xff]  }
  0x68   : > { %781 = vmatprep.subr.bf16.mxu0 %v1203_v16  ;;  %v1226_v60 = vld [vmem:[%s1625_s24 + $0xdc] ss:$12 sps:$4 sm:$0xff]   ;;  %v1228_v61 = vld [vmem:[%s1625_s24 + $0xe0] ss:$12 sps:$4 sm:$0xff]   ;;  %v1235_v3 = vld [vmem:[%s1625_s24 + $0x38] ss:$12 sps:$4 sm:$0xff]  }
  0x69   : > { %v1230_v63 = vld [vmem:[%s1625_s24 + $0x20] ss:$12 sps:$4 sm:$0xff]   ;;  %1087 = vmatprep.subr.bf16.mxu1 %v1228_v61  ;;  %v1240_v7 = vld [vmem:[%s1625_s24 + $0x50] ss:$12 sps:$4 sm:$0xff]   ;;  %v1245_v11 = vld [vmem:[%s1625_s24 + $0x68] ss:$12 sps:$4 sm:$0xff]  }
  0x6a   : > { %1088 = vmatpush3.bf16.msra.mxu1 %v1230_v63  ;;  %v1244_v10 = vld [vmem:[%s1625_s24 + $0x120] ss:$12 sps:$4 sm:$0xff]   ;;  %v1246_v12 = vld [vmem:[%s1625_s24 + $0x13c] ss:$12 sps:$4 sm:$0xff]   ;;  %v1249_v14 = vld [vmem:[%s1625_s24 + $0x138] ss:$12 sps:$4 sm:$0xff]  }
  0x6b   : > { %782 = vmatpush1.bf16.msra.mxu0 %v1205_v19  ;;  %v1248_v13 = vld [vmem:[%s1625_s24 + $0x140] ss:$12 sps:$4 sm:$0xff]   ;;  %v1253_v17 = vld [vmem:[%s1625_s24 + $0x158] ss:$12 sps:$4 sm:$0xff]   ;;  %v1254_v18 = vld [vmem:[%s1625_s24 + $0x150] ss:$12 sps:$4 sm:$0xff]  }
  0x6c   : > { %783 = vmatprep.subr.bf16.mxu0 %v1206_v20  ;;  %v1250_v15 = vld [vmem:[%s1625_s24 + $0x80] ss:$12 sps:$4 sm:$0xff]   ;;  %v1255_v19 = vld [vmem:[%s1625_s24 + $0x98] ss:$12 sps:$4 sm:$0xff]   ;;  %s1866_s11 = smov (!%p316_p10, %s315_s11), 5  ;;  %s908_s16 = sshll.u32 %s1751_s14, 4  ;;  %s1763_s16 = int_to_ptr.vmem [resolvable:$true] %s908_s16 }
  0x6d   : > { %v1251_v16 = vld [vmem:[%s1625_s24 + $0x154] ss:$12 sps:$4 sm:$0xff]   ;;  %v1256_v20 = vld [vmem:[%s1625_s24 + $0x16c] ss:$12 sps:$4 sm:$0xff]   ;;  %s318_s8 = scalar_lea.vmem %s1823_s2, %s1866_s11  ;;  %s1422_s27 = smov [#allocation7]  }
  0x6e   : > { %s1331_s29 = sshll.u32 %s1422_s27, 4  ;;  %s1332_s29 = int_to_ptr.vmem [resolvable:$false] %s1331_s29 }
  0x6f   : > { %784 = vmatpush1.bf16.msra.mxu0 %v1208_v21  ;;  %v1258_v21 = vld [vmem:[%s1625_s24 + $0x170] ss:$12 sps:$4 sm:$0xff]   ;;  %s1333_s6 = scalar_lea.vmem %s1332_s29, 3072  ;;  %p1334_p3 = scmp.lt.s32.totalorder %s1763_s16, %s1332_s29 }
  0x70   : > { %785 = vmatprep.subr.bf16.mxu0 %v1209_v22  ;;  %v1259_v22 = vld [vmem:[%s1625_s24 + $0x168] ss:$12 sps:$4 sm:$0xff]  }
  0x73   : > { %786 = vmatpush1.bf16.msra.mxu0 %v1211_v23  ;;  %v1260_v23 = vld [vmem:[%s1625_s24 + $0xb0] ss:$12 sps:$4 sm:$0xff]  }
  0x74   : > { %787 = vmatprep.subr.bf16.mxu0 %v1212_v24 }
  0x77   : > { %788 = vmatpush1.bf16.msra.mxu0 %v1214_v25 }
  0x78   : > { %789 = vmatprep.subr.bf16.mxu0 %v1215_v26 }
  0x7b   : > { %790 = vmatpush1.bf16.msra.mxu0 %v1217_v27  ;;  %v398_v27 = vlaneseq }
  0x7c   : > { %791 = vmatprep.subr.bf16.mxu0 %v1218_v28 }
  0x7f   : > { %792 = vmatpush1.bf16.msra.mxu0 %v1220_v29 }
  0x80   : > { %793 = vmatprep.subr.bf16.mxu0 %v1221_v30 }
  0x83   : > { %794 = vmatpush1.bf16.msra.mxu0 %v1224_v31 }
  0x84   : > { %795 = vmatprep.subr.bf16.mxu0 %v1226_v60 }
  0x87   : > { %796 = vmatpush1.bf16.msra.mxu0 %v1229_v62 }
  0xee   : > { %v333_v32 = vpop.xlane.xlu0 %332 }
  0xef   : > { %v344_v33 = vmul.f32 0.00390625, %v333_v32  ;;  %v339_v34 = vpop.xlane.xlu1 %338 }
  0xf0   : > { %v346_v35 = vmul.f32 0.00390625, %v339_v34  ;;  %v1727_v34 = vshrl.u32 %v398_v27, 7 }
  0xf1   : > { %v1663_v36 = vsub.f32 %v323_v0, %v344_v33  ;;  %v1665_v37 = vsub.f32 %v324_v1, %v344_v33  ;;  %v1231_v0 = vld [vmem:[%s1625_s24 + $0xf4] ss:$12 sps:$4 sm:$0xff]   ;;  %v1233_v1 = vld [vmem:[%s1625_s24 + $0xf8] ss:$12 sps:$4 sm:$0xff]  }
  0xf2   : > { %v1667_v38 = vsub.f32 %v327_v2, %v346_v35  ;;  %v1669_v39 = vsub.f32 %v328_v4, %v346_v35  ;;  %v336_v40 = vpop.xlane.xlu0 %335  ;;  %v1234_v2 = vld [vmem:[%s1625_s24 + $0xf0] ss:$12 sps:$4 sm:$0xff]   ;;  %797 = vmatprep.subr.bf16.mxu0 %v1231_v0  ;;  %1089 = vmatprep.subr.bf16.mxu1 %v1233_v1  ;;  %v1236_v4 = vld [vmem:[%s1625_s24 + $0x10c] ss:$12 sps:$4 sm:$0xff]  }
  0xf3   : > { %v345_v41 = vmul.f32 0.00390625, %v336_v40  ;;  %v342_v42 = vpop.xlane.xlu1 %341  ;;  %v356_v43 = vmul.f32 %v1663_v36, %v1663_v36  ;;  %v357_v44 = vmul.f32 %v1665_v37, %v1665_v37  ;;  %798 = vmatpush1.bf16.msra.mxu0 %v1234_v2  ;;  %1090 = vmatpush3.bf16.msra.mxu1 %v1235_v3 }
  0xf4   : > { %v347_v45 = vmul.f32 0.00390625, %v342_v42  ;;  %v360_v46 = vmul.f32 %v1667_v38, %v1667_v38  ;;  %v361_v47 = vmul.f32 %v1669_v39, %v1669_v39  ;;  %799 = vmatprep.subr.bf16.mxu0 %v1236_v4  ;;  %v400_v42 = vsub.s32 0, %v1727_v34 }
  0xf5   : > { %v1680_v48 = vsub.f32 %v1631_v5, %v345_v41  ;;  %v1683_v49 = vsub.f32 %v1633_v6, %v345_v41  ;;  %v364_v50 = vadd.f32 %v357_v44, %v356_v43  ;;  %v1238_v5 = vld [vmem:[%s1625_s24 + $0x110] ss:$12 sps:$4 sm:$0xff]   ;;  %v1239_v6 = vld [vmem:[%s1625_s24 + $0x108] ss:$12 sps:$4 sm:$0xff]   ;;  %v404_v43 = vsub.s32 1, %v1727_v34 }
  0xf6   : > { %v1686_v51 = vsub.f32 %v1635_v8, %v347_v45  ;;  %v1689_v52 = vsub.f32 %v1637_v9, %v347_v45  ;;  %v370_v53 = vadd.f32 %v361_v47, %v360_v46  ;;  %1091 = vmatprep.subr.bf16.mxu1 %v1238_v5  ;;  %v1241_v8 = vld [vmem:[%s1625_s24 + $0x124] ss:$12 sps:$4 sm:$0xff]   ;;  %v1243_v9 = vld [vmem:[%s1625_s24 + $0x128] ss:$12 sps:$4 sm:$0xff]   ;;  %v396_v44 = vld [vmem:[%s1824_s3] sm:$0x3] }
  0xf7   : > { %365 = vadd.xlane.f32.xlu0 %v364_v50  ;;  %v358_v54 = vmul.f32 %v1680_v48, %v1680_v48  ;;  %v359_v55 = vmul.f32 %v1683_v49, %v1683_v49  ;;  %800 = vmatpush1.bf16.msra.mxu0 %v1239_v6  ;;  %v401_v46 = vrot.slane %v396_v44, %v400_v42  ;;  %s1327_s24 = scalar_lea.vmem %s1763_s16, 1536 }
  0xf8   : > { %v362_v56 = vmul.f32 %v1686_v51, %v1686_v51  ;;  %v363_v57 = vmul.f32 %v1689_v52, %v1689_v52  ;;  %1092 = vmatpush3.bf16.msra.mxu1 %v1240_v7  ;;  %801 = vmatprep.subr.bf16.mxu0 %v1241_v8  ;;  %v405_v47 = vrot.slane %v396_v44, %v404_v43  ;;  %p1328_p11 = scmp.ne.s32.totalorder %s1763_s16, %s1327_s24  ;;  %p1335_p7 = scmp.lt.s32.totalorder %s1333_s6, %s1327_s24 }
  0xf9   : > { %v367_v58 = vadd.f32 %v359_v55, %v358_v54  ;;  %1093 = vmatprep.subr.bf16.mxu1 %v1243_v9 }
  0xfa   : > { %v373_v59 = vadd.f32 %v363_v57, %v362_v56  ;;  %p1329_p5 = pnand %p1328_p11, %p1853_p13  ;;  %p1336_p8 = por %p1335_p7, %p1334_p3 }
  0xfb   : > { %371 = vadd.xlane.f32.xlu0 %v370_v53  ;;  %368 = vadd.xlane.f32.xlu1 %v367_v58  ;;  %v416_v53 = vld [vmem:[%s1825_s4] sm:$0x3] }
  0xfc   : > { %802 = vmatpush1.bf16.msra.mxu0 %v1244_v10  ;;  %1094 = vmatpush3.bf16.msra.mxu1 %v1245_v11  ;;  %v421_v57 = vrot.slane %v416_v53, %v400_v42  ;;  %v425_v58 = vrot.slane %v416_v53, %v404_v43  ;;  %p1330_p1 = pneg %p1329_p5 }
  0xfd   : > { %803 = vmatprep.subr.bf16.mxu0 %v1246_v12  ;;  %1095 = vmatprep.subr.bf16.mxu1 %v1248_v13 }
  0xfe   : > { %p1337_p0 = pnand %p1336_p8, %p1330_p1 }
  0xff   : > { %374 = vadd.xlane.f32.xlu1 %v373_v59 }
 0x100   : > { %804 = vmatpush1.bf16.msra.mxu0 %v1249_v14  ;;  %1096 = vmatpush3.bf16.msra.mxu1 %v1250_v15  ;;  %v516_v15 = vsub.s32 2, %v1727_v34 }
 0x101   : > { %805 = vmatprep.subr.bf16.mxu0 %v1251_v16  ;;  %1097 = vmatprep.subr.bf16.mxu1 %v1253_v17 }
 0x104   : > { %806 = vmatpush1.bf16.msra.mxu0 %v1254_v18  ;;  %1098 = vmatpush3.bf16.msra.mxu1 %v1255_v19 }
 0x105   : > { %807 = vmatprep.subr.bf16.mxu0 %v1256_v20  ;;  %1099 = vmatprep.subr.bf16.mxu1 %v1258_v21 }
 0x108   : > { %808 = vmatpush1.bf16.msra.mxu0 %v1259_v22  ;;  %1100 = vmatpush3.bf16.msra.mxu1 %v1260_v23 }
 0x184   : > { %v366_v24 = vpop.xlane.xlu0 %365 }
 0x185   : > { %v376_v25 = vmul.f32 0.00390625, %v366_v24 }
 0x187   : > { %v380_v26 = vadd.f32 1e-05, %v376_v25 }
 0x188   : > { %v369_v28 = vpop.xlane.xlu1 %368  ;;  %v372_v29 = vpop.xlane.xlu0 %371 }
 0x189   : > { %1261 = vrsqrt.f32 %v380_v26  ;;  %v377_v30 = vmul.f32 0.00390625, %v369_v28  ;;  %v378_v31 = vmul.f32 0.00390625, %v372_v29 }
 0x18b   : > { %v381_v32 = vadd.f32 1e-05, %v377_v30  ;;  %v382_v33 = vadd.f32 1e-05, %v378_v31 }
 0x18c   : > { %v375_v35 = vpop.xlane.xlu1 %374 }
 0x18d   : > { %1263 = vrsqrt.f32 %v381_v32  ;;  %v379_v40 = vmul.f32 0.00390625, %v375_v35 }
 0x18e   : > { %1265 = vrsqrt.f32 %v382_v33 }
 0x18f   : > { %v383_v41 = vadd.f32 1e-05, %v379_v40 }
 0x191   : > { %1267 = vrsqrt.f32 %v383_v41 }
 0x193   : > { %v1262_v45 = vpop.eup %1261 }
 0x194   : > { %v389_v50 = vmul.f32 %v1262_v45, %v1665_v37  ;;  %v388_v54 = vmul.f32 %v1262_v45, %v1663_v36 }
 0x196   : > { %v409_v56 = vmul.f32 %v405_v47, %v389_v50  ;;  %v408_v59 = vmul.f32 %v401_v46, %v388_v54 }
 0x197   : > { %v1264_v55 = vpop.eup %1263 }
 0x198   : > { %v1266_v60 = vpop.eup %1265  ;;  %v391_v61 = vmul.f32 %v1264_v55, %v1683_v49  ;;  %v390_v62 = vmul.f32 %v1264_v55, %v1680_v48  ;;  %v429_v2 = vadd.f32 %v425_v58, %v409_v56  ;;  %v428_v3 = vadd.f32 %v421_v57, %v408_v59 }
 0x199   : > { %v393_v63 = vmul.f32 %v1266_v60, %v1669_v39  ;;  %v392_v8 = vmul.f32 %v1266_v60, %v1667_v38  ;;  %v504_v38 = vld [vmem:[%s318_s8] sm:$0x7] }
 0x19a   : > { %v411_v0 = vmul.f32 %v405_v47, %v391_v61  ;;  %v410_v37 = vmul.f32 %v401_v46, %v390_v62  ;;  %v509_v16 = vrot.slane %v504_v38, %v400_v42  ;;  %v513_v17 = vrot.slane %v504_v38, %v404_v43 }
 0x19b   : > { %v1268_v1 = vpop.eup %1267  ;;  %v413_v4 = vmul.f32 %v405_v47, %v393_v63  ;;  %v412_v12 = vmul.f32 %v401_v46, %v392_v8  ;;  %v517_v20 = vrot.slane %v504_v38, %v516_v15 }
 0x19c   : > { %v431_v5 = vadd.f32 %v425_v58, %v411_v0  ;;  %v430_v36 = vadd.f32 %v421_v57, %v410_v37  ;;  %v395_v6 = vmul.f32 %v1268_v1, %v1689_v52  ;;  %v394_v7 = vmul.f32 %v1268_v1, %v1686_v51 }
 0x19d   : > { %v433_v39 = vadd.f32 %v425_v58, %v413_v4  ;;  %v432_v51 = vadd.f32 %v421_v57, %v412_v12 }
 0x19e   : > { %v437_v9 = vpack.c.bf16 %v431_v5, %v429_v2  ;;  %v436_v49 = vpack.c.bf16 %v430_v36, %v428_v3  ;;  %v415_v10 = vmul.f32 %v405_v47, %v395_v6  ;;  %v414_v48 = vmul.f32 %v401_v46, %v394_v7 }
 0x1a0   : > { %809 = vmatprep.mubr.bf16.mxu0 %v437_v9  ;;  %862 = vmatprep.mubr.bf16.mxu1 %v437_v9  ;;  %v435_v11 = vadd.f32 %v425_v58, %v415_v10  ;;  %v434_v14 = vadd.f32 %v421_v57, %v414_v48 }
 0x1a1   : > { %810 = vmatmul.mubr.bf16.vlgmr.msra.gmra.mrb[0].mxu0 %v436_v49  ;;  %863 = vmatmul.mubr.bf16.vlgmr.msra.gmra.mrb[0].mxu1 %v436_v49 }
 0x1a2   : > { %v439_v13 = vpack.c.bf16 %v435_v11, %v433_v39  ;;  %v438_v52 = vpack.c.bf16 %v434_v14, %v432_v51 }
 0x1a4   : > { %819 = vmatprep.mubr.bf16.mxu0 %v439_v13  ;;  %870 = vmatprep.mubr.bf16.mxu1 %v439_v13 }
 0x1a9   : > { %820 = vmatmul.mubr.bf16.gmra.mrb[4].mxu0 %v438_v52  ;;  %871 = vmatmul.mubr.bf16.gmra.mrb[4].mxu1 %v438_v52 }
 0x274   : > { %v811_v18 = vpop.f32.mrb[0].mxu0  ;;  %v1101_v19 = vpop.f32.mrb[0].mxu1 }
 0x275   : > { %v812_v21 = vadd.f32 %v811_v18, %v509_v16  ;;  %v813_v22 = vpop.f32.mrb[1].mxu0  ;;  %v1102_v23 = vpop.f32.mrb[1].mxu1 }
 0x276   : > { %v814_v24 = vadd.f32 %v813_v22, %v513_v17  ;;  %v1103_v25 = vadd.f32 %v1102_v23, %v1101_v19  ;;  %v815_v26 = vpop.f32.mrb[2].mxu0  ;;  %v1104_v27 = vpop.f32.mrb[2].mxu1 }
 0x277   : > { %879 = vst [vmem:[%s1751_s14] sm:$0xff] %v812_v21  ;;  %v816_v28 = vadd.f32 %v815_v26, %v509_v16  ;;  %v817_v29 = vpop.f32.mrb[3].mxu0  ;;  %v1105_v30 = vpop.f32.mrb[3].mxu1 }
 0x278   : > { %880 = vst [vmem:[%s1751_s14 + $0x8] sm:$0xff] %v814_v24  ;;  %v865_v31 = vadd.f32 %v1103_v25, %v517_v20  ;;  %v818_v32 = vadd.f32 %v817_v29, %v513_v17  ;;  %v1106_v33 = vadd.f32 %v1105_v30, %v1104_v27 }
 0x279   : > { %882 = vst [vmem:[%s1751_s14 + $0x18] sm:$0xff] %v816_v28 }
 0x27a   : > { %881 = vst [vmem:[%s1751_s14 + $0x10] sm:$0xff] %v865_v31  ;;  %883 = vst [vmem:[%s1751_s14 + $0x20] sm:$0xff] %v818_v32  ;;  %v868_v34 = vadd.f32 %v1106_v33, %v517_v20 }
 0x27c   : > { %884 = vst [vmem:[%s1751_s14 + $0x28] sm:$0xff] %v868_v34  ;;  %v821_v35 = vpop.f32.mrb[4].mxu0  ;;  %v1107_v40 = vpop.f32.mrb[4].mxu1 }
 0x27d   : > { %v822_v41 = vadd.f32 %v821_v35, %v509_v16  ;;  %v823_v42 = vpop.f32.mrb[5].mxu0  ;;  %v1108_v43 = vpop.f32.mrb[5].mxu1 }
 0x27e   : > { %v824_v44 = vadd.f32 %v823_v42, %v513_v17  ;;  %v1109_v45 = vadd.f32 %v1108_v43, %v1107_v40  ;;  %v825_v46 = vpop.f32.mrb[6].mxu0  ;;  %v1110_v47 = vpop.f32.mrb[6].mxu1 }
 0x27f   : > { %885 = vst [vmem:[%s1751_s14 + $0x30] sm:$0xff] %v822_v41  ;;  %v826_v50 = vadd.f32 %v825_v46, %v509_v16  ;;  %v827_v53 = vpop.f32.mrb[7].mxu0  ;;  %v1111_v54 = vpop.f32.mrb[7].mxu1 }
 0x280   : > { %886 = vst [vmem:[%s1751_s14 + $0x38] sm:$0xff] %v824_v44  ;;  %v873_v55 = vadd.f32 %v1109_v45, %v517_v20  ;;  %v828_v56 = vadd.f32 %v827_v53, %v513_v17  ;;  %v1112_v57 = vadd.f32 %v1111_v54, %v1110_v47 }
 0x281   : > { %888 = vst [vmem:[%s1751_s14 + $0x48] sm:$0xff] %v826_v50 }
 0x282   : > { %887 = vst [vmem:[%s1751_s14 + $0x40] sm:$0xff] %v873_v55  ;;  %889 = vst [vmem:[%s1751_s14 + $0x50] sm:$0xff] %v828_v56  ;;  %v876_v58 = vadd.f32 %v1112_v57, %v517_v20 }
 0x284   : > { %890 = vst [vmem:[%s1751_s14 + $0x58] sm:$0xff] %v876_v58 }
 0x285   : > { %1340 = shalt.err (!%p1337_p0)
}
 0x286   : > { %s1341_s7 = scalar_lea.hbm %s1769_s25, 1536  ;;  %s1345_s15 = scalar_lea.hbm %s1826_s5, 3072 }
 0x287   : > { %p1342_p4 = scmp.ne.s32.totalorder %s1769_s25, %s1341_s7  ;;  %p1346_p2 = scmp.lt.u32.totalorder %s1769_s25, %s1826_s5 }
 0x288   : > { %p1347_p9 = scmp.lt.u32.totalorder %s1345_s15, %s1341_s7  ;;  %p1349_p11 = scmp.lt.u32.totalorder %s1341_s7, %s1769_s25 }
 0x289   : > { %p1343_p6 = pnand %p1342_p4, %p1853_p13 }
 0x28a   : > { %p1348_p10 = por %p1347_p9, %p1346_p2 }
 0x28b   : > { %p1344_p12 = pneg %p1343_p6 }
 0x28c   : > { %p1350_p5 = por %p1349_p11, %p1348_p10 }
 0x28e   : > { %p1351_p1 = pnand %p1350_p5, %p1344_p12 }
 0x290   : > { %1354 = shalt.err (!%p1351_p1)
}
 0x291   : > { %s1423_s14 = smov 384   ;;  %s1424_s23 = smov 768  }
 0x292   : > { %s1425_s21 = smov 24  }
 0x293   : > { %1122 = dma.vmem_to_hbm [thread:$0]  (%p1853_p13), %s1763_s16, 1536, %s1769_s25, %s892_s28, %s1423_s14, %s1424_s23, %s1425_s21  }
 0x294 PF: > { %s1854_s26 = sld [smem:[#allocation12_spill]]  ;;  %s1855_s24 = sld [smem:[#allocation11_spill]] }
 0x295   : > { %s923_s27 = sand.u32 1, %s1393_s18  }
 0x296   : > { %s924_s29 = scalar_lea.sflag [#allocation4], %s923_s27 }
 0x29a   : > { %p1856_p3 = scmp.ne.s32.totalorder %s1854_s26, 0  ;;  %p1857_p7 = scmp.ge.s32.totalorder %s1855_s24, 2 }
 0x29c   : > { %p1133_p8 = pnand %p1857_p7, %p1856_p3 }
 0x29e   : > { %1388 = dma.done.wait (!%p1133_p8), %s924_s29, 1536  }
 0x29f   : > { %1390 = vsyncadd (!%p1133_p8), %s924_s29, 4294965760  ;;  %s22_s23 = sadd.s32 1, %s1855_s24   ;;  %s1858_s18 = smov %s1397_s19 }
 0x2a0   : > { %p19_p0 = scmp.ge.s32.totalorder %s22_s23, 4   ;;  %s1859_s19 = smov %s1401_s20 }
 0x2a1   : > { %s1860_s20 = smov %s1582_s13  ;;  %s1861_s21 = smov %s1409_s22 }
 0x2a2   : > { %s1862_s22 = smov %s1864_s12  ;;  %21 = sbr.rel (!%p19_p0) target bundleno = 7 (0x7), region = 94 }
 0x2a9   :  { %929 = vsyncpa [#allocation3], 1 }
 0x2aa   :  { %931 = vsyncpa [#allocation3 + $0x1], 1 }
 0x2ab   :  { %932 = vsyncpa [#allocation6], 1 }
 0x2ac   :  { %934 = vsyncpa [#allocation6 + $0x1], 1 }
 0x2ad   :  { %935 = vsyncpa [#allocation4], 1 }
 0x2ae   :  { %937 = vsyncpa [#allocation4 + $0x1], 1 }

</bundles_post_ra>
